<compile_context>
chip_gen: v6e
topology: v6e:2x2x1
jax: 0.10.0
libtpu: 0.0.40
codegen_flags: <defaults>
</compile_context>

<pallas_src>
import math

import jax
import jax.numpy as jnp
from jax.experimental import pallas as pl
from jax.experimental.pallas import tpu as pltpu


def _round_up(x, m):
    return ((x + m - 1) // m) * m


def _actor_critic_kernel(x_ref, w1_ref, b1_ref, w2_ref, b2_ref,
                         wh_ref, bh_ref, out_ref):
    """One batch tile: feature MLP + fused (actor || critic) head.

    Matmul operands may be bf16 (x / weights); all accumulation is f32 on the
    MXU and the bias-add / ReLU elementwise work stays in f32.
    """
    x = x_ref[...]

    h1 = jnp.dot(x, w1_ref[...], preferred_element_type=jnp.float32) + b1_ref[...]
    h1 = jnp.maximum(h1, 0.0)

    h2 = (jnp.dot(h1.astype(w2_ref.dtype), w2_ref[...],
                  preferred_element_type=jnp.float32) + b2_ref[...])
    h2 = jnp.maximum(h2, 0.0)

    # Fused actor+critic head -> one lane-dense [TILE_B, HEAD_PAD] store
    # (padded weight/bias columns are zero, so padded lanes stay zero).
    out_ref[...] = (jnp.dot(h2.astype(wh_ref.dtype), wh_ref[...],
                            preferred_element_type=jnp.float32) + bh_ref[...])


def actor_critic_forward(x, params, *, tile_b=512, compute_dtype=jnp.float32):
    """Fused ActorCriticNetwork forward. Returns (logits, value).

    x: [B, state_dim] float32. Weights in `params` are stored [in, out]
    (transposed vs. PyTorch) so the kernel computes x @ W directly.
    compute_dtype: dtype of the matmul operands (use jnp.bfloat16 on v6e/v7x
    to halve HBM traffic; accumulation stays f32 either way).
    """
    B, state_dim = x.shape
    hidden_dim = params["w1"].shape[1]
    action_dim = params["wa"].shape[1]

    # --- Head fusion: [hidden, action_dim] ++ [hidden, 1], zero-padded to a
    #     lane-dense multiple of 128 so the output store is unmasked.
    head_dim = action_dim + 1
    head_pad = _round_up(head_dim, 128)
    wh = jnp.concatenate([params["wa"], params["wc"]], axis=1)
    wh = jnp.pad(wh, ((0, 0), (0, head_pad - head_dim)))
    bh = jnp.concatenate([params["ba"], params["bc"]], axis=1)
    bh = jnp.pad(bh, ((0, 0), (0, head_pad - head_dim)))

    # --- Batch tiling: TILE_B rows per grid step (f32 sublane multiple of 8).
    tile_b = max(8, _round_up(min(tile_b, _round_up(B, 8)), 8))
    b_pad = _round_up(B, tile_b)
    if b_pad != B:
        x = jnp.pad(x, ((0, b_pad - B), (0, 0)))

    # Matmul operands may be downcast; biases stay f32 (added post-accumulate).
    xk = x.astype(compute_dtype)
    w1 = params["w1"].astype(compute_dtype)
    w2 = params["w2"].astype(compute_dtype)
    whk = wh.astype(compute_dtype)
    b1 = params["b1"].astype(jnp.float32)
    b2 = params["b2"].astype(jnp.float32)
    bhk = bh.astype(jnp.float32)

    def resident(shape):
        # Whole-array weight/bias block, same tile for every grid step.
        return pl.BlockSpec(shape, lambda i: (0, 0))

    out = pl.pallas_call(
        _actor_critic_kernel,
        out_shape=jax.ShapeDtypeStruct((b_pad, head_pad), jnp.float32),
        grid_spec=pltpu.PrefetchScalarGridSpec(
            num_scalar_prefetch=0,
            grid=(b_pad // tile_b,),
            in_specs=[
                pl.BlockSpec((tile_b, state_dim), lambda i: (i, 0)),   # x tile
                resident((state_dim, hidden_dim)),                      # w1
                resident((1, hidden_dim)),                              # b1
                resident((hidden_dim, hidden_dim)),                     # w2
                resident((1, hidden_dim)),                              # b2
                resident((hidden_dim, head_pad)),                       # fused head W
                resident((1, head_pad)),                                # fused head b
            ],
            out_specs=pl.BlockSpec((tile_b, head_pad), lambda i: (i, 0)),
        ),
        compiler_params=pltpu.CompilerParams(
            dimension_semantics=("parallel",)),   # shard batch tiles across TCs (v7x)
    )(xk, w1, b1, w2, b2, whk, bhk)

    logits = out[:B, :action_dim]
    value = out[:B, action_dim:action_dim + 1]
    return logits, value


def init_params(key, state_dim, action_dim, hidden_dim):
    """Deterministic init mirroring the module: orthogonal(gain=sqrt(2)), bias=0.

    Weights are stored as [in, out] (transposed vs. PyTorch's [out, in]) so the
    kernel computes x @ W directly.
    """
    ortho = jax.nn.initializers.orthogonal(scale=math.sqrt(2.0))
    k1, k2, k3, k4 = jax.random.split(key, 4)
    return {
        "w1": ortho(k1, (state_dim, hidden_dim), jnp.float32),
        "b1": jnp.zeros((1, hidden_dim), jnp.float32),
        "w2": ortho(k2, (hidden_dim, hidden_dim), jnp.float32),
        "b2": jnp.zeros((1, hidden_dim), jnp.float32),
        "wa": ortho(k3, (hidden_dim, action_dim), jnp.float32),
        "ba": jnp.zeros((1, action_dim), jnp.float32),
        "wc": ortho(k4, (hidden_dim, 1), jnp.float32),
        "bc": jnp.zeros((1, 1), jnp.float32),
    }


def _reference_forward(x, p):
    """Plain-JAX reference (exact module semantics, f32)."""
    h1 = jnp.maximum(x @ p["w1"] + p["b1"], 0.0)
    h2 = jnp.maximum(h1 @ p["w2"] + p["b2"], 0.0)
    return h2 @ p["wa"] + p["ba"], h2 @ p["wc"] + p["bc"]


if __name__ == "__main__":
    # Small, module-consistent shapes: batch=2 states of dim 16, hidden=32, 4 actions.
    B, STATE_DIM, ACTION_DIM, HIDDEN_DIM = 2, 16, 4, 32

    key = jax.random.PRNGKey(0)
    k_x, k_p, k_x2 = jax.random.split(key, 3)
    x = jax.random.normal(k_x, (B, STATE_DIM), dtype=jnp.float32)
    params = init_params(k_p, STATE_DIM, ACTION_DIM, HIDDEN_DIM)

    # 1) f32 path at the tiny shape (exact module semantics).
    logits, value = actor_critic_forward(x, params)
    jax.block_until_ready((logits, value))
    ref_logits, ref_value = _reference_forward(x, params)
    assert logits.shape == (B, ACTION_DIM) and value.shape == (B, 1)
    assert jnp.allclose(logits, ref_logits, atol=1e-5, rtol=1e-5)
    assert jnp.allclose(value, ref_value, atol=1e-5, rtol=1e-5)

    # 2) Larger batch exercising the grid (padding 300 -> 384, 3 tiles of 128).
    B2 = 300
    x2 = jax.random.normal(k_x2, (B2, STATE_DIM), dtype=jnp.float32)
    logits2, value2 = actor_critic_forward(x2, params, tile_b=128)
    jax.block_until_ready((logits2, value2))
    ref_l2, ref_v2 = _reference_forward(x2, params)
    assert logits2.shape == (B2, ACTION_DIM) and value2.shape == (B2, 1)
    assert jnp.allclose(logits2, ref_l2, atol=1e-4, rtol=1e-4)
    assert jnp.allclose(value2, ref_v2, atol=1e-4, rtol=1e-4)

    # 3) bf16-operand / f32-accumulate path (HBM-bandwidth saving on v6e/v7x).
    logits3, value3 = actor_critic_forward(x2, params, tile_b=128,
                                           compute_dtype=jnp.bfloat16)
    jax.block_until_ready((logits3, value3))
    assert jnp.allclose(logits3, ref_l2, atol=1e-1, rtol=5e-2)
    assert jnp.allclose(value3, ref_v2, atol=1e-1, rtol=5e-2)

    # TODO(synk): torch.distributions.Categorical/Normal construction and the
    # .act() sampling / log_prob are host-side glue with no Pallas equivalent;
    # the kernel returns the distribution parameters (logits) and the value.
    print("KERNEL_OK")
</pallas_src>

<mosaic_0001>
module attributes {stable_mosaic.version = 11 : i64} {
  func.func @_actor_critic_kernel(%arg0: i32, %arg1: memref<8x16xf32, #tpu.memory_space<vmem>>, %arg2: memref<16x32xf32, #tpu.memory_space<vmem>>, %arg3: memref<1x32xf32, #tpu.memory_space<vmem>>, %arg4: memref<32x32xf32, #tpu.memory_space<vmem>>, %arg5: memref<1x32xf32, #tpu.memory_space<vmem>>, %arg6: memref<32x128xf32, #tpu.memory_space<vmem>>, %arg7: memref<1x128xf32, #tpu.memory_space<vmem>>, %arg8: memref<8x128xf32, #tpu.memory_space<vmem>>) attributes {dimension_semantics = [#tpu.dimension_semantics<parallel>], iteration_bounds = array<i64: 1>, scalar_prefetch = 0 : i64, scratch_operands = 0 : i64, tpu.core_type = #tpu.core_type<tc>, window_params = [{transform_indices = @transform_0, window_bounds = array<i64: 8, 16>}, {pipeline_mode = #tpu.pipeline_mode<synchronous>, transform_indices = @transform_1, window_bounds = array<i64: 16, 32>}, {pipeline_mode = #tpu.pipeline_mode<synchronous>, transform_indices = @transform_2, window_bounds = array<i64: 1, 32>}, {pipeline_mode = #tpu.pipeline_mode<synchronous>, transform_indices = @transform_3, window_bounds = array<i64: 32, 32>}, {pipeline_mode = #tpu.pipeline_mode<synchronous>, transform_indices = @transform_4, window_bounds = array<i64: 1, 32>}, {pipeline_mode = #tpu.pipeline_mode<synchronous>, transform_indices = @transform_5, window_bounds = array<i64: 32, 128>}, {pipeline_mode = #tpu.pipeline_mode<synchronous>, transform_indices = @transform_6, window_bounds = array<i64: 1, 128>}, {transform_indices = @transform_7, window_bounds = array<i64: 8, 128>}]} {
    %c0 = arith.constant 0 : index
    %c0_0 = arith.constant 0 : index
    %0 = vector.load %arg1[%c0, %c0_0] : memref<8x16xf32, #tpu.memory_space<vmem>>, vector<8x16xf32>
    %c0_1 = arith.constant 0 : index
    %c0_2 = arith.constant 0 : index
    %1 = vector.load %arg2[%c0_1, %c0_2] : memref<16x32xf32, #tpu.memory_space<vmem>>, vector<16x32xf32>
    %cst = arith.constant dense<0.000000e+00> : vector<8x32xf32>
    %2 = tpu.matmul %0, %1, %cst {dimension_numbers = #tpu.dot_dimension_numbers<[1], [0], [0], [1], [0, 0, 1, 1], [], []>} : vector<8x16xf32>, vector<16x32xf32>, vector<8x32xf32> -> vector<8x32xf32>
    %c0_3 = arith.constant 0 : index
    %c0_4 = arith.constant 0 : index
    %3 = vector.load %arg3[%c0_3, %c0_4] : memref<1x32xf32, #tpu.memory_space<vmem>>, vector<1x32xf32>
    %4 = vector.broadcast %3 : vector<1x32xf32> to vector<8x32xf32>
    %5 = arith.addf %2, %4 : vector<8x32xf32>
    %cst_5 = arith.constant 0.000000e+00 : f32
    %6 = vector.broadcast %cst_5 : f32 to vector<8x32xf32>
    %7 = arith.maximumf %5, %6 : vector<8x32xf32>
    %c0_6 = arith.constant 0 : index
    %c0_7 = arith.constant 0 : index
    %8 = vector.load %arg4[%c0_6, %c0_7] : memref<32x32xf32, #tpu.memory_space<vmem>>, vector<32x32xf32>
    %cst_8 = arith.constant dense<0.000000e+00> : vector<8x32xf32>
    %9 = tpu.matmul %7, %8, %cst_8 {dimension_numbers = #tpu.dot_dimension_numbers<[1], [0], [0], [1], [0, 0, 1, 1], [], []>} : vector<8x32xf32>, vector<32x32xf32>, vector<8x32xf32> -> vector<8x32xf32>
    %c0_9 = arith.constant 0 : index
    %c0_10 = arith.constant 0 : index
    %10 = vector.load %arg5[%c0_9, %c0_10] : memref<1x32xf32, #tpu.memory_space<vmem>>, vector<1x32xf32>
    %11 = vector.broadcast %10 : vector<1x32xf32> to vector<8x32xf32>
    %12 = arith.addf %9, %11 : vector<8x32xf32>
    %cst_11 = arith.constant 0.000000e+00 : f32
    %13 = vector.broadcast %cst_11 : f32 to vector<8x32xf32>
    %14 = arith.maximumf %12, %13 : vector<8x32xf32>
    %c0_12 = arith.constant 0 : index
    %c0_13 = arith.constant 0 : index
    %15 = vector.load %arg6[%c0_12, %c0_13] : memref<32x128xf32, #tpu.memory_space<vmem>>, vector<32x128xf32>
    %cst_14 = arith.constant dense<0.000000e+00> : vector<8x128xf32>
    %16 = tpu.matmul %14, %15, %cst_14 {dimension_numbers = #tpu.dot_dimension_numbers<[1], [0], [0], [1], [0, 0, 1, 1], [], []>} : vector<8x32xf32>, vector<32x128xf32>, vector<8x128xf32> -> vector<8x128xf32>
    %c0_15 = arith.constant 0 : index
    %c0_16 = arith.constant 0 : index
    %17 = vector.load %arg7[%c0_15, %c0_16] : memref<1x128xf32, #tpu.memory_space<vmem>>, vector<1x128xf32>
    %18 = vector.broadcast %17 : vector<1x128xf32> to vector<8x128xf32>
    %19 = arith.addf %16, %18 : vector<8x128xf32>
    %c0_17 = arith.constant 0 : index
    %c0_18 = arith.constant 0 : index
    %20 = vector.load %arg8[%c0_17, %c0_18] : memref<8x128xf32, #tpu.memory_space<vmem>>, vector<8x128xf32>
    tpu.vector_store %arg8[%c0_17, %c0_18], %19 {strides = array<i32>} : memref<8x128xf32, #tpu.memory_space<vmem>>, vector<8x128xf32>,
    return
  }
  func.func @transform_0(%arg0: i32) -> (i32, i32) {
    %c0_i32 = arith.constant 0 : i32
    %c0_i32_0 = arith.constant 0 : i32
    return %arg0, %c0_i32 : i32, i32
  }
  func.func @transform_1(%arg0: i32) -> (i32, i32) {
    %c0_i32 = arith.constant 0 : i32
    %c0_i32_0 = arith.constant 0 : i32
    %c0_i32_1 = arith.constant 0 : i32
    return %c0_i32, %c0_i32_0 : i32, i32
  }
  func.func @transform_2(%arg0: i32) -> (i32, i32) {
    %c0_i32 = arith.constant 0 : i32
    %c0_i32_0 = arith.constant 0 : i32
    %c0_i32_1 = arith.constant 0 : i32
    return %c0_i32, %c0_i32_0 : i32, i32
  }
  func.func @transform_3(%arg0: i32) -> (i32, i32) {
    %c0_i32 = arith.constant 0 : i32
    %c0_i32_0 = arith.constant 0 : i32
    %c0_i32_1 = arith.constant 0 : i32
    return %c0_i32, %c0_i32_0 : i32, i32
  }
  func.func @transform_4(%arg0: i32) -> (i32, i32) {
    %c0_i32 = arith.constant 0 : i32
    %c0_i32_0 = arith.constant 0 : i32
    %c0_i32_1 = arith.constant 0 : i32
    return %c0_i32, %c0_i32_0 : i32, i32
  }
  func.func @transform_5(%arg0: i32) -> (i32, i32) {
    %c0_i32 = arith.constant 0 : i32
    %c0_i32_0 = arith.constant 0 : i32
    %c0_i32_1 = arith.constant 0 : i32
    return %c0_i32, %c0_i32_0 : i32, i32
  }
  func.func @transform_6(%arg0: i32) -> (i32, i32) {
    %c0_i32 = arith.constant 0 : i32
    %c0_i32_0 = arith.constant 0 : i32
    %c0_i32_1 = arith.constant 0 : i32
    return %c0_i32, %c0_i32_0 : i32, i32
  }
  func.func @transform_7(%arg0: i32) -> (i32, i32) {
    %c0_i32 = arith.constant 0 : i32
    %c0_i32_0 = arith.constant 0 : i32
    return %arg0, %c0_i32 : i32, i32
  }
}

</mosaic_0001>

<bundles_post_ra>
// kernel: tpu_custom_call.1
= control target key start
LH: loop header
LB: loop body
LE: loop exit
PB: predicated region body
PF: predicated region fallthrough
CT: control target
= control target key end

     0   :  { %12 = vsyncpa [#allocation3], 0  ;;  %s605_s0 = inlined_call_operand.hbm [shape: f32[8,16], index: 0, kind: input, shape index: {}]   ;;  %s606_s1 = inlined_call_operand.hbm [shape: f32[16,32], index: 1, kind: input, shape index: {}]   ;;  %s607_s2 = inlined_call_operand.vmem [shape: f32[1,32], index: 2, kind: input, shape index: {}]   ;;  %s608_s3 = inlined_call_operand.hbm [shape: f32[32,32], index: 3, kind: input, shape index: {}]   ;;  %s609_s4 = inlined_call_operand.vmem [shape: f32[1,32], index: 4, kind: input, shape index: {}]   ;;  %s610_s5 = inlined_call_operand.hbm [shape: f32[32,128], index: 5, kind: input, shape index: {}]   ;;  %s611_s6 = inlined_call_operand.vmem [shape: f32[1,128], index: 6, kind: input, shape index: {}]   ;;  %s612_s7 = inlined_call_operand.hbm [shape: f32[8,128], index: 7, kind: output, shape index: {}]  }
   0x1   :  { %13 = vsyncpa [#allocation6], 0 }
   0x2   :  { %14 = vsyncpa [#allocation9], 0 }
   0x3   :  { %15 = vsyncpa [#allocation4], 0  ;;  %s518_s24 = smov [#allocation5]  }
   0x4   :  { %s31_s25 = sshll.u32 %s518_s24, 4  ;;  %s32_s25 = int_to_ptr.vmem [resolvable:$true] %s31_s25 }
   0x5   :  { %s418_s26 = scalar_lea.vmem %s32_s25, 256  ;;  %p423_p1 = scmp.lt.s32.totalorder %s32_s25, %s32_s25 }
   0x6   :  { %p419_p0 = scmp.ne.s32.totalorder %s32_s25, %s418_s26  ;;  %p424_p2 = scmp.lt.s32.totalorder %s418_s26, %s418_s26 }
   0x8   :  { %p425_p3 = por %p424_p2, %p423_p1 }
   0xa   :  { %p426_p4 = pnand %p425_p3, %p419_p0 }
   0xc   :  { %429 = shalt.err (!%p426_p4)
}
   0xd   :  { %s519_s27 = smov 128   ;;  %s520_s28 = smov 8  }
   0xe   :  { %37 = dma.hbm_to_vmem [thread:$0]  %s606_s1, 256, %s32_s25, [#allocation6], %s519_s27, %s519_s27, %s520_s28  }
   0xf   :  { %s521_s8 = smov [#allocation2]   ;;  %s522_s10 = smov [#allocation7]  }
  0x10   :  { %s22_s9 = sshll.u32 %s521_s8, 4  ;;  %s45_s11 = sshll.u32 %s522_s10, 4  ;;  %s23_s9 = int_to_ptr.vmem [resolvable:$true] %s22_s9  ;;  %s46_s11 = int_to_ptr.vmem [resolvable:$true] %s45_s11 }
  0x11   :  { %s438_s12 = scalar_lea.vmem %s23_s9, 128  ;;  %p443_p6 = scmp.lt.s32.totalorder %s23_s9, %s23_s9 }
  0x12   :  { %p439_p5 = scmp.ne.s32.totalorder %s23_s9, %s438_s12  ;;  %p444_p7 = scmp.lt.s32.totalorder %s438_s12, %s438_s12 }
  0x14   :  { %p445_p8 = por %p444_p7, %p443_p6 }
  0x16   :  { %p446_p9 = pnand %p445_p8, %p439_p5 }
  0x18   :  { %449 = shalt.err (!%p446_p9)
}
  0x19   :  { %25 = dma.hbm_to_vmem [thread:$0]  %s605_s0, 128, %s23_s9, [#allocation3]  }
  0x1a   :  { %s458_s15 = scalar_lea.vmem %s46_s11, 512  ;;  %p463_p11 = scmp.lt.s32.totalorder %s46_s11, %s46_s11 }
  0x1b   :  { %p459_p10 = scmp.ne.s32.totalorder %s46_s11, %s458_s15  ;;  %p464_p12 = scmp.lt.s32.totalorder %s458_s15, %s458_s15 }
  0x1d   :  { %p465_p13 = por %p464_p12, %p463_p11 }
  0x1f   :  { %p466_p0 = pnand %p465_p13, %p459_p10 }
  0x21   :  { %469 = shalt.err (!%p466_p0)
}
  0x22   :  { %51 = dma.hbm_to_vmem [thread:$0]  %s608_s3, 512, %s46_s11, [#allocation6], %s519_s27, %s519_s27, %s520_s28  }
  0x23   :  { %s523_s17 = smov [#allocation8]  }
  0x24   :  { %s59_s18 = sshll.u32 %s523_s17, 4  ;;  %s60_s18 = int_to_ptr.vmem [resolvable:$true] %s59_s18 }
  0x25   :  { %s478_s19 = scalar_lea.vmem %s60_s18, 512  ;;  %p483_p2 = scmp.lt.s32.totalorder %s60_s18, %s60_s18 }
  0x26   :  { %p479_p1 = scmp.ne.s32.totalorder %s60_s18, %s478_s19  ;;  %p484_p3 = scmp.lt.s32.totalorder %s478_s19, %s478_s19 }
  0x28   :  { %p485_p4 = por %p484_p3, %p483_p2 }
  0x2a   :  { %p486_p5 = pnand %p485_p4, %p479_p1 }
  0x2c   :  { %489 = shalt.err (!%p486_p5)
}
  0x2d   :  { %65 = dma.hbm_to_vmem [thread:$0]  %s610_s5, 512, %s60_s18, [#allocation9], %s519_s27, %s519_s27, %s520_s28  }
  0x2e   :  { %510 = dma.done.wait [#allocation3], 128  }
  0x2f   :  { %511 = vsyncadd [#allocation3], 4294967168 }
  0x30   :  { %512 = dma.done.wait [#allocation6], 768  }
  0x31   :  { %513 = vsyncadd [#allocation6], 4294966528 }
  0x32   :  { %514 = dma.done.wait [#allocation9], 512  }
  0x33   :  { %515 = vsyncadd [#allocation9], 4294966784  ;;  %v524_v0 = vmov 0.0   ;;  %vm525_vm0 = vmmov 0   ;;  %v82_v1 = vld [vmem:[#allocation5 + $0x8] sm:$0xff]  ;;  %v81_v2 = vld [vmem:[#allocation5] sm:$0xff] }
  0x34   :  { %372 = vmatprep.subr.mxu0 %v524_v0  ;;  %376 = vmatprep.mubr.msk.f32.mxu0 %vm525_vm0, %v524_v0  ;;  %v80_v3 = vld [vmem:[#allocation2] sm:$0xff]  ;;  %vm90_vm1 = vcmask 130048   ;;  %v168_v4 = vld [vmem:[#allocation7 + $0x18] sm:$0xff]  ;;  %v167_v5 = vld [vmem:[#allocation7 + $0x10] sm:$0xff]  ;;  %vm176_vm2 = vcmask 261120   ;;  %s526_s24 = smov [#allocation10]  }
  0x35   :  { %379 = vmatprep.subr.mxu1 %v524_v0  ;;  %387 = vmatprep.mubr.msk.f32.mxu1 %vm525_vm0, %v524_v0  ;;  %v166_v6 = vld [vmem:[#allocation7 + $0x8] sm:$0xff]  ;;  %v165_v7 = vld [vmem:[#allocation7] sm:$0xff]  ;;  %v254_v8 = vld [vmem:[#allocation8 + $0x18] sm:$0xff]  ;;  %s342_s25 = sshll.u32 %s526_s24, 4  ;;  %s343_s25 = int_to_ptr.vmem [resolvable:$true] %s342_s25 }
  0x36   :  { %373 = vmatpush3.msra.mxu0 %v82_v1  ;;  %380 = vmatpush3.msra.mxu1 %v168_v4  ;;  %v353_v9 = vld [vmem:[%s607_s2] ss:$0 sm:$0xff]  ;;  %v253_v14 = vld [vmem:[#allocation8 + $0x10] sm:$0xff]  ;;  %v251_v16 = vld [vmem:[#allocation8] sm:$0xff]  ;;  %s490_s26 = scalar_lea.vmem %s343_s25, 128  ;;  %p495_p7 = scmp.lt.s32.totalorder %s343_s25, %s343_s25 }
  0x37   :  { %374 = vmatprep.subr.mxu0 %v524_v0  ;;  %381 = vmatprep.subr.mxu1 %v524_v0  ;;  %v252_v15 = vld [vmem:[#allocation8 + $0x8] sm:$0xff]  ;;  %p491_p6 = scmp.ne.s32.totalorder %s343_s25, %s490_s26  ;;  %p496_p8 = scmp.lt.s32.totalorder %s490_s26, %s490_s26 }
  0x38   :  { %375 = vmatpush3.msra.mxu0 %v81_v2  ;;  %382 = vmatpush3.msra.mxu1 %v167_v5  ;;  %v355_v17 = vld [vmem:[%s609_s4] ss:$0 sm:$0xff] }
  0x39   :  { %377 = vmatmul.mubr.msk.f32.vlgmr.msra.gmra.mxu0 %vm90_vm1, %v80_v3  ;;  %390 = vmatprep.subr.mxu0 %v524_v0  ;;  %v357_v22 = vld [vmem:[%s611_s6] ss:$0 sm:$0xff]  ;;  %p497_p9 = por %p496_p8, %p495_p7 }
  0x3a   :  { %398 = vmatprep.mubr.msk.f32.mxu0 %vm525_vm0, %v524_v0  ;;  %383 = vmatprep.subr.mxu1 %v524_v0 }
  0x3b   :  { %384 = vmatpush3.msra.mxu1 %v166_v6  ;;  %391 = vmatpush3.msra.mxu0 %v254_v8  ;;  %p498_p10 = pnand %p497_p9, %p491_p6 }
  0x3c   :  { %385 = vmatprep.subr.mxu1 %v524_v0  ;;  %392 = vmatprep.subr.mxu0 %v524_v0 }
  0x3d   :  { %386 = vmatpush3.msra.mxu1 %v165_v7  ;;  %393 = vmatpush3.msra.mxu0 %v253_v14 }
  0x3e   :  { %394 = vmatprep.subr.mxu0 %v524_v0 }
  0x3f   :  { %395 = vmatpush3.msra.mxu0 %v252_v15 }
  0x40   :  { %396 = vmatprep.subr.mxu0 %v524_v0 }
  0x41   :  { %397 = vmatpush3.msra.mxu0 %v251_v16 }
  0xf9   :  { %v160_v10 = vpop.f32.mrf.mxu0 }
  0xfa   :  { %v161_v11 = vadd.f32 %v353_v9, %v160_v10 }
  0xfb   :  { %v378_v12 = vpop.f32.mrf.mxu0 }
  0xfc   :  { %v164_v13 = vmax.f32 %v161_v11, 0.0 }
  0xfe   :  { %388 = vmatmul.mubr.msk.f32.vlgmr.msra.gmra.mxu1 %vm176_vm2, %v164_v13 }
 0x1be   :  { %v246_v18 = vpop.f32.mrf.mxu1 }
 0x1bf   :  { %v247_v19 = vadd.f32 %v355_v17, %v246_v18 }
 0x1c0   :  { %v389_v20 = vpop.f32.mrf.mxu1 }
 0x1c1   :  { %v250_v21 = vmax.f32 %v247_v19, 0.0 }
 0x1c3   :  { %399 = vmatmul.mubr.msk.f32.vlgmr.msra.gmra.mxu0 %vm176_vm2, %v250_v21 }
 0x283   :  { %v331_v23 = vpop.f32.mrf.mxu0 }
 0x284   :  { %v332_v24 = vadd.f32 %v357_v22, %v331_v23 }
 0x285   :  { %v400_v25 = vpop.f32.mrf.mxu0 }
 0x286   :  { %335 = vst [vmem:[#allocation10] sm:$0xff] %v332_v24 }
 0x287   :  { %501 = shalt.err (!%p498_p10)
}
 0x288   :  { %345 = dma.vmem_to_hbm [thread:$0]  %s343_s25, 128, %s612_s7, [#allocation4]  }
 0x289   :  { %516 = dma.done.wait [#allocation4], 128  }
 0x28a   :  { %517 = vsyncadd [#allocation4], 4294967168 }
 0x28b   :  { %349 = vsyncpa [#allocation3], 1 }
 0x28c   :  { %350 = vsyncpa [#allocation6], 1 }
 0x28d   :  { %351 = vsyncpa [#allocation9], 1 }
 0x28e   :  { %352 = vsyncpa [#allocation4], 1 }

</bundles_post_ra>
